<compile_context>
chip_gen: v6e
topology: v6e:2x2x1
jax: 0.10.0
libtpu: 0.0.40
codegen_flags: <defaults>
</compile_context>

<pallas_src>
import math

import jax
import jax.numpy as jnp
from jax import lax
from jax.experimental import pallas as pl
from jax.experimental.pallas import tpu as pltpu


def _round_up(x, m):
    return (x + m - 1) // m * m


def _nbytes(shape, dtype):
    return math.prod(shape) * jnp.dtype(dtype).itemsize


_VMEM_CAP = None


def _vmem_cap_bytes():
    """~75% of physical VMEM (96 MiB on v5e/v6e, 48 MiB on v7x); safe fallback."""
    global _VMEM_CAP
    if _VMEM_CAP is None:
        try:
            phys = int(pltpu.get_tpu_info().vmem_capacity_bytes)
        except Exception:
            phys = 64 << 20  # conservative fallback (assume v7x-sized VMEM)
        _VMEM_CAP = max(int(phys * 3 // 4), 32 << 20)
    return _VMEM_CAP


def _pad_gate_axis(w, H, Hp):
    """Pad the trailing 4*H (i|f|g|o) axis to 4*Hp, padding each gate block."""
    lead = w.shape[:-1]
    w4 = w.reshape(lead + (4, H))
    w4 = jnp.pad(w4, [(0, 0)] * len(lead) + [(0, 0), (0, Hp - H)])
    return w4.reshape(lead + (4 * Hp,))


# ---------------------------------------------------------------------------
# Grid-tiled matmul (+ bias) kernel: a:(M,K) @ b:(K,N) + bias:(N,).
# bf16 operands (native MXU path on v6e/v7x), f32 accumulator scratch,
# output written once at the last K step.
# ---------------------------------------------------------------------------
def _matmul_bias_kernel(a_ref, b_ref, bias_ref, o_ref, acc_ref):
    k = pl.program_id(2)

    @pl.when(k == 0)
    def _():
        acc_ref[...] = jnp.zeros_like(acc_ref)

    acc_ref[...] += jnp.dot(a_ref[...], b_ref[...],
                            preferred_element_type=jnp.float32)

    @pl.when(k == pl.num_programs(2) - 1)
    def _():
        o_ref[...] = (acc_ref[...] + bias_ref[...]).astype(o_ref.dtype)


def matmul_bias(a, b, bias=None, *, out_dtype=jnp.float32,
                compute_dtype=jnp.bfloat16, tm=None, tn=None, tk=None):
    """Tiled Pallas matmul with optional bias. Pads to tile multiples, slices back."""
    M, K = a.shape
    K2, N = b.shape
    assert K == K2

    cap = _vmem_cap_bytes()
    big_vmem = cap >= (80 << 20)          # v5e / v6e (128 MiB physical VMEM)
    tm = tm or 256
    tn = tn or (512 if big_vmem else 256)
    tk = tk or (1024 if big_vmem else 512)

    tm = min(tm, _round_up(M, 8))
    tn = min(tn, _round_up(N, 128))
    tk = min(tk, _round_up(K, 128))
    Mp, Np, Kp = _round_up(M, tm), _round_up(N, tn), _round_up(K, tk)

    a_p = jnp.pad(a.astype(compute_dtype), ((0, Mp - M), (0, Kp - K)))
    b_p = jnp.pad(b.astype(compute_dtype), ((0, Kp - K), (0, Np - N)))
    if bias is None:
        bias_p = jnp.zeros((1, Np), jnp.float32)
    else:
        bias_p = jnp.pad(bias.astype(jnp.float32).reshape(1, N),
                         ((0, 0), (0, Np - N)))

    # Scoped-VMEM sizing (double-buffered tiles + f32 accumulator) w/ headroom.
    c_item = jnp.dtype(compute_dtype).itemsize
    o_item = jnp.dtype(out_dtype).itemsize
    vmem_bytes = (2 * tm * tk * c_item + 2 * tk * tn * c_item + 2 * tn * 4
                  + 2 * tm * tn * o_item + tm * tn * 4)
    vmem_limit = int(min(2 * vmem_bytes + (4 << 20), cap))

    out = pl.pallas_call(
        _matmul_bias_kernel,
        out_shape=jax.ShapeDtypeStruct((Mp, Np), out_dtype),
        grid_spec=pltpu.PrefetchScalarGridSpec(
            num_scalar_prefetch=0,
            grid=(Mp // tm, Np // tn, Kp // tk),
            in_specs=[
                pl.BlockSpec((tm, tk), lambda i, j, k: (i, k)),
                pl.BlockSpec((tk, tn), lambda i, j, k: (k, j)),
                pl.BlockSpec((1, tn), lambda i, j, k: (0, j)),
            ],
            out_specs=pl.BlockSpec((tm, tn), lambda i, j, k: (i, j)),
            scratch_shapes=[pltpu.VMEM((tm, tn), jnp.float32)],
        ),
        compiler_params=pltpu.CompilerParams(
            dimension_semantics=("parallel", "parallel", "arbitrary"),
            vmem_limit_bytes=vmem_limit),
    )(a_p, b_p, bias_p)
    return out[:M, :N]


# ---------------------------------------------------------------------------
# Recurrent LSTM-stack kernel.  All slabs are lane-dense (Hp, Ep multiples of
# 128; Bt a multiple of 8).  The grid iterates over independent batch tiles
# ("parallel" -> sharded across the 2 TensorCores on v7x); the recurrence over
# T and layers is serial inside each grid iteration.
# ---------------------------------------------------------------------------
def _make_lstm_kernel(num_layers, T, Bt, Ep, Hp, unroll):
    n_in = 1 + 3 * num_layers
    Hg = 4 * Hp

    def kernel(*args):
        emb_ref = args[0]                         # (T, Bt, Ep) bf16
        layer_refs = args[1:n_in]                 # per layer: w_ih, w_hh (bf16), b (f32)
        h_all_ref = args[n_in]                    # (T, Bt, Hp) bf16 output
        hidden_ref = args[n_in + 1]               # (L, Bt, Hp) f32
        cell_ref = args[n_in + 2]                 # (L, Bt, Hp) f32
        gx_ref = args[n_in + 3]                   # scratch (T, Bt, 4*Hp) bf16

        for layer in range(num_layers):
            w_ih = layer_refs[3 * layer][...]          # (in_dim_p, 4*Hp) bf16
            w_hh = layer_refs[3 * layer + 1][...]      # (Hp, 4*Hp) bf16
            b = layer_refs[3 * layer + 2][...]         # (1, 4*Hp) f32

            # Hoisted input projection: one large bf16 MXU matmul over the whole
            # sequence tile (instead of T tiny per-step matmuls).  Bias folded
            # in once here.  Note the full read of h_all (previous layer's
            # output) happens *before* the step loop overwrites it.
            if layer == 0:
                xin = emb_ref[...].reshape(T * Bt, Ep)
            else:
                xin = h_all_ref[...].reshape(T * Bt, Hp)
            gx = jnp.dot(xin, w_ih, preferred_element_type=jnp.float32) + b
            gx_ref[...] = gx.astype(gx_ref.dtype).reshape(T, Bt, Hg)

            def step(t, carry, w_hh=w_hh):
                h, c = carry  # f32 (Bt, Hp)
                gates = gx_ref[t].astype(jnp.float32) + jnp.dot(
                    h.astype(w_hh.dtype), w_hh,
                    preferred_element_type=jnp.float32)
                # PyTorch gate order: i, f, g, o.  Hp is a multiple of 128 so
                # every slice below is a lane-aligned, full-width slab.
                # Gate / elementwise math stays f32 (no bf16 VPU/EUP on v5e).
                i = jax.nn.sigmoid(gates[:, 0 * Hp:1 * Hp])
                f = jax.nn.sigmoid(gates[:, 1 * Hp:2 * Hp])
                g = jnp.tanh(gates[:, 2 * Hp:3 * Hp])
                o = jax.nn.sigmoid(gates[:, 3 * Hp:4 * Hp])
                c_new = f * c + i * g
                h_new = o * jnp.tanh(c_new)
                h_all_ref[t] = h_new.astype(h_all_ref.dtype)  # single per-step store
                return (h_new, c_new)

            h0 = jnp.zeros((Bt, Hp), jnp.float32)
            c0 = jnp.zeros((Bt, Hp), jnp.float32)
            h_f, c_f = lax.fori_loop(0, T, step, (h0, c0), unroll=unroll)
            hidden_ref[layer] = h_f
            cell_ref[layer] = c_f

        # TODO(synk): dropout implemented as identity (eval mode); training-mode
        # stochastic dropout is not reproduced here.

    return kernel


# ---------------------------------------------------------------------------
# Parameters
# ---------------------------------------------------------------------------
def init_params(key, vocab_size, embed_size, hidden_size, num_layers):
    """Deterministic synthetic parameters with PyTorch-convention shapes."""
    keys = jax.random.split(key, 2 + 4 * num_layers + 2)
    s = 0.1
    idx = 0
    w_emb = s * jax.random.normal(keys[idx], (embed_size, vocab_size), jnp.float32); idx += 1
    layers = []
    for l in range(num_layers):
        in_dim = embed_size if l == 0 else hidden_size
        w_ih = s * jax.random.normal(keys[idx], (4 * hidden_size, in_dim), jnp.float32); idx += 1
        w_hh = s * jax.random.normal(keys[idx], (4 * hidden_size, hidden_size), jnp.float32); idx += 1
        b_ih = s * jax.random.normal(keys[idx], (4 * hidden_size,), jnp.float32); idx += 1
        b_hh = s * jax.random.normal(keys[idx], (4 * hidden_size,), jnp.float32); idx += 1
        layers.append((w_ih, w_hh, b_ih, b_hh))
    w_out = s * jax.random.normal(keys[idx], (vocab_size, hidden_size), jnp.float32); idx += 1
    b_out = s * jax.random.normal(keys[idx], (vocab_size,), jnp.float32); idx += 1
    return dict(w_emb=w_emb, layers=layers, w_out=w_out, b_out=b_out)


def prepare_params(params, *, compute_dtype=jnp.bfloat16):
    """One-time weight prep: transpose, lane/gate pad, bf16 cast, bias fold."""
    w_emb = params["w_emb"]                  # (E, V)
    layers = params["layers"]
    w_out, b_out = params["w_out"], params["b_out"]
    E, V = w_emb.shape
    H = layers[0][1].shape[1]                # w_hh: (4H, H)
    L = len(layers)
    Ep, Hp, Vp = _round_up(E, 128), _round_up(H, 128), _round_up(V, 128)

    w_emb_p = jnp.pad(w_emb.T, ((0, Vp - V), (0, Ep - E))).astype(compute_dtype)  # (Vp, Ep)

    layer_ws = []
    for l, (w_ih, w_hh, b_ih, b_hh) in enumerate(layers):
        in_dim = E if l == 0 else H
        in_p = Ep if l == 0 else Hp
        w_ih_t = jnp.pad(w_ih.T, ((0, in_p - in_dim), (0, 0)))   # (in_p, 4H)
        w_hh_t = jnp.pad(w_hh.T, ((0, Hp - H), (0, 0)))          # (Hp, 4H)
        b = (b_ih + b_hh).reshape(1, 4 * H)
        layer_ws += [
            _pad_gate_axis(w_ih_t, H, Hp).astype(compute_dtype),
            _pad_gate_axis(w_hh_t, H, Hp).astype(compute_dtype),
            _pad_gate_axis(b, H, Hp).astype(jnp.float32),
        ]

    w_out_p = jnp.pad(w_out.T, ((0, Hp - H), (0, Vp - V))).astype(compute_dtype)  # (Hp, Vp)
    b_out_p = jnp.pad(b_out.astype(jnp.float32), (0, Vp - V))                      # (Vp,)

    return dict(V=V, E=E, H=H, L=L, Ep=Ep, Hp=Hp, Vp=Vp,
                w_emb_p=w_emb_p, layer_ws=tuple(layer_ws),
                w_out_p=w_out_p, b_out_p=b_out_p)


# ---------------------------------------------------------------------------
# Forward
# ---------------------------------------------------------------------------
def lstm_forward(x, prep, *, compute_dtype=jnp.bfloat16):
    """x: (B, T, V) float32. Returns (out (B,T,V), (hidden (L,B,H), cell (L,B,H)))."""
    B, T, V = x.shape
    assert V == prep["V"]
    E, H, L = prep["E"], prep["H"], prep["L"]
    Ep, Hp, Vp = prep["Ep"], prep["Hp"], prep["Vp"]
    Hg = 4 * Hp

    # Batch padding / tiling: batch is padded to a sublane multiple; when the
    # padded batch is large enough we split it into 2 "parallel" tiles so the
    # recurrent kernel can shard across v7x's two TensorCores.
    Bp = _round_up(B, 8)
    if Bp >= 16:
        Bp = _round_up(Bp, 16)
        Bt = Bp // 2
    else:
        Bt = Bp
    n_btiles = Bp // Bt

    x_tb = jnp.transpose(x.astype(jnp.float32), (1, 0, 2))        # (T, B, V)
    x_tb = jnp.pad(x_tb, ((0, 0), (0, Bp - B), (0, Vp - V)))       # (T, Bp, Vp)

    # ---- embedding: (T*Bp, Vp) @ (Vp, Ep), grid-tiled Pallas matmul, bf16 out
    emb = matmul_bias(x_tb.reshape(T * Bp, Vp), prep["w_emb_p"],
                      out_dtype=compute_dtype, compute_dtype=compute_dtype)
    emb = emb.reshape(T, Bp, Ep)

    # ---- recurrent LSTM stack (batch-tile-parallel Pallas call) ------------
    flat = (emb,) + prep["layer_ws"]

    in_specs = [pl.BlockSpec((T, Bt, Ep), lambda b: (0, b, 0))]
    for l in range(L):
        in_p = Ep if l == 0 else Hp
        in_specs += [
            pl.BlockSpec((in_p, Hg), lambda b: (0, 0)),
            pl.BlockSpec((Hp, Hg), lambda b: (0, 0)),
            pl.BlockSpec((1, Hg), lambda b: (0, 0)),
        ]
    out_specs = [
        pl.BlockSpec((T, Bt, Hp), lambda b: (0, b, 0)),
        pl.BlockSpec((L, Bt, Hp), lambda b: (0, b, 0)),
        pl.BlockSpec((L, Bt, Hp), lambda b: (0, b, 0)),
    ]
    out_shapes = (
        jax.ShapeDtypeStruct((T, Bp, Hp), compute_dtype),   # h_all (bf16)
        jax.ShapeDtypeStruct((L, Bp, Hp), jnp.float32),     # hidden
        jax.ShapeDtypeStruct((L, Bp, Hp), jnp.float32),     # cell
    )

    # VMEM budget: double-buffered in/out blocks + bf16 gates_x scratch.
    in_bytes = _nbytes((T, Bt, Ep), compute_dtype)
    for l in range(L):
        in_p = Ep if l == 0 else Hp
        in_bytes += (_nbytes((in_p, Hg), compute_dtype)
                     + _nbytes((Hp, Hg), compute_dtype)
                     + _nbytes((1, Hg), jnp.float32))
    out_bytes = (_nbytes((T, Bt, Hp), compute_dtype)
                 + 2 * _nbytes((L, Bt, Hp), jnp.float32))
    scratch_bytes = _nbytes((T, Bt, Hg), compute_dtype)
    cap = _vmem_cap_bytes()
    vmem_limit = int(min(2 * in_bytes + 2 * out_bytes + scratch_bytes + (8 << 20), cap))

    # Bounded unroll so the per-step live set fits the 64-vreg file.
    unroll = T if (Hp <= 256 and T <= 16) else min(4, T)

    kernel = _make_lstm_kernel(L, T, Bt, Ep, Hp, unroll)
    h_all, hidden, cell = pl.pallas_call(
        kernel,
        out_shape=out_shapes,
        grid_spec=pltpu.PrefetchScalarGridSpec(
            num_scalar_prefetch=0,
            grid=(n_btiles,),
            in_specs=in_specs,
            out_specs=out_specs,
            scratch_shapes=[pltpu.VMEM((T, Bt, Hg), compute_dtype)],
        ),
        compiler_params=pltpu.CompilerParams(
            dimension_semantics=("parallel",),
            vmem_limit_bytes=vmem_limit),
    )(*flat)

    # ---- final projection: (T*Bp, Hp) @ (Hp, Vp) + b, grid-tiled -----------
    logits = matmul_bias(h_all.reshape(T * Bp, Hp), prep["w_out_p"],
                         prep["b_out_p"], out_dtype=jnp.float32,
                         compute_dtype=compute_dtype)
    logits = logits.reshape(T, Bp, Vp)[:, :B, :V]
    out = jnp.transpose(logits, (1, 0, 2))                         # (B, T, V)

    return out, (hidden[:, :B, :H], cell[:, :B, :H])


# ---------------------------------------------------------------------------
# Pure-JAX f32 reference matching the PyTorch forward semantics.
# ---------------------------------------------------------------------------
def reference_forward(x, params):
    emb = x @ params["w_emb"].T
    layer_in = emb
    hs, cs = [], []
    for (w_ih, w_hh, b_ih, b_hh) in params["layers"]:
        B, T, _ = layer_in.shape
        H = w_hh.shape[1]
        h = jnp.zeros((B, H), jnp.float32)
        c = jnp.zeros((B, H), jnp.float32)
        outs = []
        for t in range(T):
            gates = layer_in[:, t, :] @ w_ih.T + b_ih + h @ w_hh.T + b_hh
            i, f, g, o = jnp.split(gates, 4, axis=-1)
            i, f, g, o = jax.nn.sigmoid(i), jax.nn.sigmoid(f), jnp.tanh(g), jax.nn.sigmoid(o)
            c = f * c + i * g
            h = o * jnp.tanh(c)
            outs.append(h)
        layer_in = jnp.stack(outs, axis=1)
        hs.append(h)
        cs.append(c)
    out = layer_in @ params["w_out"].T + params["b_out"]
    return out, (jnp.stack(hs), jnp.stack(cs))


if __name__ == "__main__":
    B, T = 2, 8
    vocab_size, embed_size, hidden_size, num_layers = 64, 32, 32, 2

    key = jax.random.PRNGKey(0)
    kx, kp = jax.random.split(key)
    x = jax.random.normal(kx, (B, T, vocab_size), jnp.float32)
    params = init_params(kp, vocab_size, embed_size, hidden_size, num_layers)

    prep = prepare_params(params)            # one-time weight prep (hoisted)
    out, (hidden, cell) = lstm_forward(x, prep)
    jax.block_until_ready((out, hidden, cell))

    assert out.shape == (B, T, vocab_size)
    assert hidden.shape == (num_layers, B, hidden_size)
    assert cell.shape == (num_layers, B, hidden_size)

    ref_out, (ref_h, ref_c) = reference_forward(x, params)
    # bf16 MXU operands (f32 accumulation) throughout, so compare with a
    # slightly looser tolerance than pure-f32 would need.
    assert jnp.allclose(out, ref_out, atol=2e-2, rtol=2e-2)
    assert jnp.allclose(hidden, ref_h, atol=2e-2, rtol=2e-2)
    assert jnp.allclose(cell, ref_c, atol=2e-2, rtol=2e-2)

    print("KERNEL_OK")
</pallas_src>

<mosaic_0001>
module attributes {stable_mosaic.version = 11 : i64} {
  func.func @_matmul_bias_kernel(%arg0: i32, %arg1: i32, %arg2: i32, %arg3: memref<64x128xbf16, #tpu.memory_space<vmem>>, %arg4: memref<128x128xbf16, #tpu.memory_space<vmem>>, %arg5: memref<1x128xf32, #tpu.memory_space<vmem>>, %arg6: memref<64x128xbf16, #tpu.memory_space<vmem>>, %arg7: memref<64x128xf32, #tpu.memory_space<vmem>>) attributes {dimension_semantics = [#tpu.dimension_semantics<parallel>, #tpu.dimension_semantics<parallel>, #tpu.dimension_semantics<arbitrary>], iteration_bounds = array<i64: 1, 1, 1>, scalar_prefetch = 0 : i64, scratch_operands = 1 : i64, tpu.core_type = #tpu.core_type<tc>, window_params = [{transform_indices = @transform_0, window_bounds = array<i64: 64, 128>}, {transform_indices = @transform_1, window_bounds = array<i64: 128, 128>}, {transform_indices = @transform_2, window_bounds = array<i64: 1, 128>}, {transform_indices = @transform_3, window_bounds = array<i64: 64, 128>}]} {
    %c0_i32 = arith.constant 0 : i32
    %0 = arith.cmpi eq, %arg2, %c0_i32 : i32
    %1 = arith.extui %0 : i1 to i32
    %c0_i32_0 = arith.constant 0 : i32
    %2 = arith.cmpi ne, %1, %c0_i32_0 : i32
    scf.if %2 {
      %cst_10 = arith.constant 0.000000e+00 : f32
      %12 = vector.broadcast %cst_10 : f32 to vector<64x128xf32>
      %c0_11 = arith.constant 0 : index
      %c0_12 = arith.constant 0 : index
      %13 = vector.load %arg7[%c0_11, %c0_12] : memref<64x128xf32, #tpu.memory_space<vmem>>, vector<64x128xf32>
      tpu.vector_store %arg7[%c0_11, %c0_12], %12 {strides = array<i32>} : memref<64x128xf32, #tpu.memory_space<vmem>>, vector<64x128xf32>,
    } else {
    }
    %c0 = arith.constant 0 : index
    %c0_1 = arith.constant 0 : index
    %3 = vector.load %arg7[%c0, %c0_1] : memref<64x128xf32, #tpu.memory_space<vmem>>, vector<64x128xf32>
    %c0_2 = arith.constant 0 : index
    %c0_3 = arith.constant 0 : index
    %4 = vector.load %arg3[%c0_2, %c0_3] : memref<64x128xbf16, #tpu.memory_space<vmem>>, vector<64x128xbf16>
    %c0_4 = arith.constant 0 : index
    %c0_5 = arith.constant 0 : index
    %5 = vector.load %arg4[%c0_4, %c0_5] : memref<128x128xbf16, #tpu.memory_space<vmem>>, vector<128x128xbf16>
    %cst = arith.constant dense<0.000000e+00> : vector<64x128xf32>
    %6 = tpu.matmul %4, %5, %cst {dimension_numbers = #tpu.dot_dimension_numbers<[1], [0], [0], [1], [0, 0, 1, 1], [], []>} : vector<64x128xbf16>, vector<128x128xbf16>, vector<64x128xf32> -> vector<64x128xf32>
    %7 = arith.addf %3, %6 : vector<64x128xf32>
    %c0_6 = arith.constant 0 : index
    %c0_7 = arith.constant 0 : index
    %8 = vector.load %arg7[%c0_6, %c0_7] : memref<64x128xf32, #tpu.memory_space<vmem>>, vector<64x128xf32>
    tpu.vector_store %arg7[%c0_6, %c0_7], %7 {strides = array<i32>} : memref<64x128xf32, #tpu.memory_space<vmem>>, vector<64x128xf32>,
    %c0_i32_8 = arith.constant 0 : i32
    %9 = arith.cmpi eq, %arg2, %c0_i32_8 : i32
    %10 = arith.extui %9 : i1 to i32
    %c0_i32_9 = arith.constant 0 : i32
    %11 = arith.cmpi ne, %10, %c0_i32_9 : i32
    scf.if %11 {
      %c0_10 = arith.constant 0 : index
      %c0_11 = arith.constant 0 : index
      %12 = vector.load %arg7[%c0_10, %c0_11] : memref<64x128xf32, #tpu.memory_space<vmem>>, vector<64x128xf32>
      %c0_12 = arith.constant 0 : index
      %c0_13 = arith.constant 0 : index
      %13 = vector.load %arg5[%c0_12, %c0_13] : memref<1x128xf32, #tpu.memory_space<vmem>>, vector<1x128xf32>
      %14 = vector.broadcast %13 : vector<1x128xf32> to vector<64x128xf32>
      %15 = arith.addf %12, %14 : vector<64x128xf32>
      %16 = arith.truncf %15 : vector<64x128xf32> to vector<64x128xbf16>
      %c0_14 = arith.constant 0 : index
      %c0_15 = arith.constant 0 : index
      %17 = vector.load %arg6[%c0_14, %c0_15] : memref<64x128xbf16, #tpu.memory_space<vmem>>, vector<64x128xbf16>
      tpu.vector_store %arg6[%c0_14, %c0_15], %16 {strides = array<i32>} : memref<64x128xbf16, #tpu.memory_space<vmem>>, vector<64x128xbf16>,
    } else {
    }
    return
  }
  func.func @transform_0(%arg0: i32, %arg1: i32, %arg2: i32) -> (i32, i32) {
    %c0_i32 = arith.constant 0 : i32
    return %arg0, %arg2 : i32, i32
  }
  func.func @transform_1(%arg0: i32, %arg1: i32, %arg2: i32) -> (i32, i32) {
    %c0_i32 = arith.constant 0 : i32
    return %arg2, %arg1 : i32, i32
  }
  func.func @transform_2(%arg0: i32, %arg1: i32, %arg2: i32) -> (i32, i32) {
    %c0_i32 = arith.constant 0 : i32
    %c0_i32_0 = arith.constant 0 : i32
    return %c0_i32, %arg1 : i32, i32
  }
  func.func @transform_3(%arg0: i32, %arg1: i32, %arg2: i32) -> (i32, i32) {
    %c0_i32 = arith.constant 0 : i32
    return %arg0, %arg1 : i32, i32
  }
}

</mosaic_0001>

<bundles_post_ra>
// kernel: tpu_custom_call.1
= control target key start
LH: loop header
LB: loop body
LE: loop exit
PB: predicated region body
PF: predicated region fallthrough
CT: control target
= control target key end

     0   :  { %8 = vsyncpa [#allocation4], 0  ;;  %s558_s0 = inlined_call_operand.hbm [shape: bf16[64,128], index: 0, kind: input, shape index: {}]   ;;  %s559_s1 = inlined_call_operand.hbm [shape: bf16[128,128], index: 1, kind: input, shape index: {}]   ;;  %s560_s2 = inlined_call_operand.vmem [shape: f32[1,128], index: 2, kind: input, shape index: {}]   ;;  %s561_s3 = inlined_call_operand.hbm [shape: bf16[64,128], index: 3, kind: output, shape index: {}]  }
   0x1   :  { %9 = vsyncpa [#allocation7], 0 }
   0x2   :  { %10 = vsyncpa [#allocation5], 0  ;;  %s512_s12 = smov [#allocation3]  }
   0x3   :  { %s16_s13 = sshll.u32 %s512_s12, 4  ;;  %s17_s13 = int_to_ptr.vmem [resolvable:$true] %s16_s13 }
   0x4   :  { %s454_s14 = scalar_lea.vmem %s17_s13, 512  ;;  %p459_p1 = scmp.lt.s32.totalorder %s17_s13, %s17_s13 }
   0x5   :  { %p455_p0 = scmp.ne.s32.totalorder %s17_s13, %s454_s14  ;;  %p460_p2 = scmp.lt.s32.totalorder %s454_s14, %s454_s14 }
   0x7   :  { %p461_p3 = por %p460_p2, %p459_p1 }
   0x9   :  { %p462_p4 = pnand %p461_p3, %p455_p0 }
   0xb   :  { %465 = shalt.err (!%p462_p4)
}
   0xc   :  { %s513_s15 = smov 64   ;;  %s514_s16 = smov 4  }
   0xd   :  { %22 = dma.hbm_to_vmem [thread:$0]  %s558_s0, 512, %s17_s13, [#allocation4], %s513_s15, %s513_s15, %s514_s16  }
   0xe   :  { %s515_s19 = smov [#allocation6]  }
   0xf   :  { %s28_s20 = sshll.u32 %s515_s19, 4  ;;  %s29_s20 = int_to_ptr.vmem [resolvable:$true] %s28_s20 }
  0x10   :  { %s474_s21 = scalar_lea.vmem %s29_s20, 1024  ;;  %p479_p6 = scmp.lt.s32.totalorder %s29_s20, %s29_s20 }
  0x11   :  { %p475_p5 = scmp.ne.s32.totalorder %s29_s20, %s474_s21  ;;  %p480_p7 = scmp.lt.s32.totalorder %s474_s21, %s474_s21 }
  0x13   :  { %p481_p8 = por %p480_p7, %p479_p6 }
  0x15   :  { %p482_p9 = pnand %p481_p8, %p475_p5 }
  0x17   :  { %485 = shalt.err (!%p482_p9)
}
  0x18   :  { %34 = dma.hbm_to_vmem [thread:$0]  %s559_s1, 1024, %s29_s20, [#allocation7], %s513_s15, %s513_s15, %s514_s16  }
  0x19   :  { %506 = dma.done.wait [#allocation4], 512  }
  0x1a   :  { %507 = vsyncadd [#allocation4], 4294966784 }
  0x1b   :  { %508 = dma.done.wait [#allocation7], 1024  }
  0x1c   :  { %509 = vsyncadd [#allocation7], 4294966272  ;;  %v434_v0 = vld [vmem:[#allocation6 + $0x38] sm:$0xff]   ;;  %v435_v1 = vld [vmem:[#allocation6 + $0x30] sm:$0xff]   ;;  %s516_s24 = smov [#allocation8]  }
  0x1d   :  { %389 = vmatprep.subr.bf16.mxu0 %v434_v0  ;;  %413 = vmatprep.subr.bf16.mxu1 %v434_v0  ;;  %v436_v2 = vld [vmem:[#allocation6 + $0x28] sm:$0xff]   ;;  %v437_v3 = vld [vmem:[#allocation6 + $0x20] sm:$0xff]   ;;  %v443_v5 = vld [vmem:[#allocation3 + $0x10] sm:$0xff]   ;;  %s312_s25 = sshll.u32 %s516_s24, 4  ;;  %s313_s25 = int_to_ptr.vmem [resolvable:$true] %s312_s25 }
  0x1e   :  { %390 = vmatpush3.bf16.msra.mxu0 %v434_v0  ;;  %421 = vmatpush3.bf16.msra.mxu1 %v434_v0  ;;  %v442_v4 = vld [vmem:[#allocation3] sm:$0xff]   ;;  %v438_v6 = vld [vmem:[#allocation6 + $0x18] sm:$0xff]   ;;  %v439_v7 = vld [vmem:[#allocation6 + $0x10] sm:$0xff]   ;;  %p491_p11 = scmp.lt.s32.totalorder %s313_s25, %s313_s25 }
  0x1f   :  { %391 = vmatprep.subr.bf16.mxu0 %v435_v1  ;;  %414 = vmatprep.subr.bf16.mxu1 %v435_v1  ;;  %v440_v8 = vld [vmem:[#allocation6 + $0x8] sm:$0xff]   ;;  %v441_v9 = vld [vmem:[#allocation6] sm:$0xff]   ;;  %v445_v11 = vld [vmem:[#allocation3 + $0x18] sm:$0xff]  }
  0x20   :  { %405 = vmatprep.mubr.bf16.mxu0 %v442_v4  ;;  %409 = vmatprep.mubr.bf16.mxu1 %v443_v5  ;;  %v444_v10 = vld [vmem:[#allocation3 + $0x8] sm:$0xff]   ;;  %v337_v14 = vld [vmem:[%s560_s2] ss:$0 sm:$0xff]  ;;  %s486_s2 = scalar_lea.vmem %s313_s25, 512 }
  0x21   :  { %p487_p10 = scmp.ne.s32.totalorder %s313_s25, %s486_s2  ;;  %p492_p12 = scmp.lt.s32.totalorder %s486_s2, %s486_s2 }
  0x22   :  { %392 = vmatpush3.bf16.msra.mxu0 %v435_v1  ;;  %422 = vmatpush3.bf16.msra.mxu1 %v435_v1 }
  0x23   :  { %393 = vmatprep.subr.bf16.mxu0 %v436_v2  ;;  %415 = vmatprep.subr.bf16.mxu1 %v436_v2  ;;  %p493_p13 = por %p492_p12, %p491_p11 }
  0x25   :  { %p494_p0 = pnand %p493_p13, %p487_p10 }
  0x26   :  { %394 = vmatpush3.bf16.msra.mxu0 %v436_v2  ;;  %423 = vmatpush3.bf16.msra.mxu1 %v436_v2 }
  0x27   :  { %395 = vmatprep.subr.bf16.mxu0 %v437_v3  ;;  %416 = vmatprep.subr.bf16.mxu1 %v437_v3 }
  0x2a   :  { %396 = vmatpush3.bf16.msra.mxu0 %v437_v3  ;;  %424 = vmatpush3.bf16.msra.mxu1 %v437_v3 }
  0x2b   :  { %397 = vmatprep.subr.bf16.mxu0 %v438_v6  ;;  %417 = vmatprep.subr.bf16.mxu1 %v438_v6 }
  0x2e   :  { %398 = vmatpush3.bf16.msra.mxu0 %v438_v6  ;;  %425 = vmatpush3.bf16.msra.mxu1 %v438_v6 }
  0x2f   :  { %399 = vmatprep.subr.bf16.mxu0 %v439_v7  ;;  %418 = vmatprep.subr.bf16.mxu1 %v439_v7 }
  0x32   :  { %400 = vmatpush3.bf16.msra.mxu0 %v439_v7  ;;  %426 = vmatpush3.bf16.msra.mxu1 %v439_v7 }
  0x33   :  { %401 = vmatprep.subr.bf16.mxu0 %v440_v8  ;;  %419 = vmatprep.subr.bf16.mxu1 %v440_v8 }
  0x36   :  { %402 = vmatpush3.bf16.msra.mxu0 %v440_v8  ;;  %427 = vmatpush3.bf16.msra.mxu1 %v440_v8 }
  0x37   :  { %403 = vmatprep.subr.bf16.mxu0 %v441_v9  ;;  %420 = vmatprep.subr.bf16.mxu1 %v441_v9 }
  0x3a   :  { %404 = vmatpush3.bf16.msra.mxu0 %v441_v9  ;;  %428 = vmatpush3.bf16.msra.mxu1 %v441_v9 }
  0x3d   :  { %406 = vmatmul.mubr.bf16.vlgmr.msra.gmra.mxu0 %v444_v10  ;;  %410 = vmatmul.mubr.bf16.vlgmr.msra.gmra.mxu1 %v445_v11 }
  0xfd   :  { %v407_v12 = vpop.f32.mrf.mxu0  ;;  %v411_v13 = vpop.f32.mrf.mxu1 }
  0xfe   :  { %v261_v19 = vadd.f32 %v407_v12, %v337_v14  ;;  %v265_v20 = vadd.f32 %v411_v13, %v337_v14 }
  0xff   :  { %v194_v15 = vpop.f32.mrf.mxu0  ;;  %v210_v16 = vpop.f32.mrf.mxu1 }
 0x100   :  { %v259_v23 = vadd.f32 %v337_v14, %v194_v15  ;;  %v263_v24 = vadd.f32 %v337_v14, %v210_v16 }
 0x101   :  { %v408_v17 = vpop.f32.mrf.mxu0  ;;  %v412_v18 = vpop.f32.mrf.mxu1 }
 0x102   :  { %v262_v21 = vadd.f32 %v408_v17, %v337_v14  ;;  %v266_v22 = vadd.f32 %v412_v18, %v337_v14 }
 0x103   :  { %v197_v25 = vpop.f32.mrf.mxu0  ;;  %v213_v26 = vpop.f32.mrf.mxu1 }
 0x104   :  { %v362_v27 = vpack.c.bf16 %v262_v21, %v261_v19  ;;  %v372_v28 = vpack.c.bf16 %v266_v22, %v265_v20  ;;  %v260_v29 = vadd.f32 %v337_v14, %v197_v25  ;;  %v264_v30 = vadd.f32 %v337_v14, %v213_v26 }
 0x106   :  { %374 = vst [vmem:[#allocation8 + $0x8] sm:$0xff] %v362_v27   ;;  %376 = vst [vmem:[#allocation8 + $0x18] sm:$0xff] %v372_v28   ;;  %v357_v31 = vpack.c.bf16 %v260_v29, %v259_v23  ;;  %v367_v32 = vpack.c.bf16 %v264_v30, %v263_v24 }
 0x108   :  { %358 = vst [vmem:[#allocation8] sm:$0xff] %v357_v31   ;;  %375 = vst [vmem:[#allocation8 + $0x10] sm:$0xff] %v367_v32  }
 0x109   :  { %497 = shalt.err (!%p494_p0)
}
 0x10a   :  { %318 = dma.vmem_to_hbm [thread:$0]  %s313_s25, 512, %s561_s3, [#allocation5], %s513_s15, %s513_s15, %s514_s16  }
 0x10b   :  { %510 = dma.done.wait [#allocation5], 512  }
 0x10c   :  { %511 = vsyncadd [#allocation5], 4294966784 }
 0x10d   :  { %322 = vsyncpa [#allocation4], 1 }
 0x10e   :  { %323 = vsyncpa [#allocation7], 1 }
 0x10f   :  { %324 = vsyncpa [#allocation5], 1 }

</bundles_post_ra>
